<compile_context>
chip_gen: v7x
topology: tpu7x:2x2x1
jax: 0.10.0
libtpu: 0.0.40
codegen_flags: <defaults>
</compile_context>

<pallas_src>
import functools

import jax
import jax.numpy as jnp
import numpy as np
from jax import lax
from jax.experimental import pallas as pl
from jax.experimental.pallas import tpu as pltpu

EPS = 1e-5  # nn.BatchNorm2d default eps


def _fused_act(pf_img, wmat, bias, wp, hw):
    """conv(3x3,pad=1) + 2x2 max-pool + bias + ReLU for one image.

    pf_img: (8, hw + wp) f32  -- flattened tap planes with row stride exactly wp
    wmat:   (4, Cout, 16) f32 -- per pool-phase weights over the 16 shifted tap rows
    bias:   (Cout, 1) f32
    returns (Cout, hw) f32
    """
    # 16 tap rows: rows 0..7 = planes at pooled-row offset 0, rows 8..15 = the same planes
    # shifted by one pooled row (drop the first wp lanes).  Exact-wp stride => no garbage lanes.
    d = jnp.concatenate([pf_img[:, :hw], pf_img[:, wp:wp + hw]], axis=0)    # (16, hw)
    acc = jnp.dot(wmat[0], d, preferred_element_type=jnp.float32)           # (Cout, hw)
    for p in range(1, 4):  # fuse the 2x2 max-pool over the 4 phases
        acc = jnp.maximum(acc, jnp.dot(wmat[p], d, preferred_element_type=jnp.float32))
    # bias hoisted out of the max: max(a+b, c+b) == max(a, c) + b
    return jnp.maximum(acc + bias, 0.0)


def _stats_kernel(pf_ref, w_ref, b_ref, stat_ref, *, nb, wp, hw, cout):
    """Pass 1: per-grid-step partial BN statistics over NB images (sum, sum of squares)."""
    wmat = w_ref[...]
    bias = b_ref[...]

    def body(i, carry):
        s, q = carry
        act = _fused_act(pf_ref[i], wmat, bias, wp, hw)      # (Cout, hw)
        return s + jnp.sum(act, axis=1), q + jnp.sum(act * act, axis=1)

    zero = jnp.zeros((cout,), jnp.float32)
    s, q = lax.fori_loop(0, nb, body, (zero, zero))
    # One tiny lane-major (Cout on lanes) store per grid step.
    stat_ref[0, 0, :] = s
    stat_ref[0, 1, :] = q


def _norm_kernel(pf_ref, w_ref, b_ref, mean_ref, invstd_ref, out_ref, *, nb, wp, hw):
    """Pass 2: recompute fused activation and apply global BatchNorm; NCHW-flat output."""
    wmat = w_ref[...]
    bias = b_ref[...]
    mean = mean_ref[...]          # (Cout, 1)
    invstd = invstd_ref[...]      # (Cout, 1)

    def body(i, c):
        act = _fused_act(pf_ref[i], wmat, bias, wp, hw)      # (Cout, hw)
        out_ref[i] = (act - mean) * invstd
        return c

    lax.fori_loop(0, nb, body, 0)


def _pick_batch_tile(n, per_image_bytes, max_block_bytes=4 << 20, min_steps=2):
    """Largest divisor of n that fits the VMEM budget and keeps >= min_steps grid steps."""
    cap = max(1, min(n, max_block_bytes // max(per_image_bytes, 1)))
    if n >= min_steps:
        cap = min(cap, n // min_steps)   # keep >= 2 parallel steps for v7x dual-TC sharding
    cap = max(cap, 1)
    for nb in range(cap, 0, -1):
        if n % nb == 0:
            return nb
    return 1


def neta_forward(x, conv_w, conv_b):
    """x: (N, 1, H, W) float32; conv_w: (30, 1, 3, 3); conv_b: (30,)."""
    N, Cin, H, W = x.shape
    assert Cin == 1 and H % 2 == 0 and W % 2 == 0
    Cout = conv_w.shape[0]
    Hp, Wp = H // 2, W // 2
    HW = Hp * Wp
    Lf = HW + Wp                         # = (Hp + 1) * Wp

    # ---- glue (XLA, ~2x |x| bytes): pad + space-to-depth tap planes ------------------------
    xp = jnp.pad(x[:, 0].astype(jnp.float32), ((0, 0), (1, 1), (1, 1)))   # (N, H+2, W+2)
    planes = []
    for a in (0, 1):
        for b in (0, 1):
            cos = xp[:, a::2, b::2]                                       # (N, Hp+1, Wp+1)
            for oj in (0, 1):
                planes.append(cos[:, :, oj:oj + Wp].reshape(N, Lf))
    pf = jnp.stack(planes, axis=1)                                        # (N, 8, Lf)

    # ---- per-phase weight matrices over the 16 shifted tap rows (static selection table) ---
    sel = np.zeros((4, 16, 9), np.float32)
    for dh in range(2):
        for dw in range(2):
            ph = dh * 2 + dw
            for kh in range(3):
                for kw in range(3):
                    a, oi = (dh + kh) % 2, (dh + kh) // 2
                    b, oj = (dw + kw) % 2, (dw + kw) // 2
                    sel[ph, oi * 8 + a * 4 + b * 2 + oj, kh * 3 + kw] = 1.0
    w9 = conv_w.astype(jnp.float32).reshape(Cout, 9)
    wmat = jnp.einsum("ptk,ck->pct", jnp.asarray(sel), w9)                # (4, Cout, 16)
    bias = conv_b.astype(jnp.float32).reshape(Cout, 1)

    # ---- tiling: NB whole images per grid step (double-buffered in + out, f32) -------------
    per_img_bytes = 4 * (2 * 8 * Lf + 2 * Cout * HW)
    NB = _pick_batch_tile(N, per_img_bytes)
    G = N // NB

    parallel1 = pltpu.CompilerParams(dimension_semantics=("parallel",))

    # ---- pass 1: fused conv->pool->relu + per-step partial BN sums --------------------------
    stats = pl.pallas_call(
        functools.partial(_stats_kernel, nb=NB, wp=Wp, hw=HW, cout=Cout),
        grid=(G,),
        in_specs=[
            pl.BlockSpec((NB, 8, Lf), lambda g: (g, 0, 0)),
            pl.BlockSpec((4, Cout, 16), lambda g: (0, 0, 0)),
            pl.BlockSpec((Cout, 1), lambda g: (0, 0)),
        ],
        out_specs=pl.BlockSpec((1, 2, Cout), lambda g: (g, 0, 0)),
        out_shape=jax.ShapeDtypeStruct((G, 2, Cout), jnp.float32),
        compiler_params=parallel1,
    )(pf, wmat, bias)

    # ---- tiny finalize in XLA: global training-mode BN stats (biased variance) -------------
    # NOTE: E[x^2] - mean^2 (clamped at 0) in f32; adequate at 2e-4 tolerance for this model.
    cnt = jnp.float32(N * HW)
    mean = jnp.sum(stats[:, 0, :], axis=0) / cnt                          # (Cout,)
    ex2 = jnp.sum(stats[:, 1, :], axis=0) / cnt
    var = jnp.maximum(ex2 - mean * mean, 0.0)
    invstd = lax.rsqrt(var + EPS)
    # TODO(synk): running_mean/running_var updates (momentum=0.1) are a training-time side
    # effect on module buffers, not part of the returned tensor; not implemented here.

    # ---- pass 2: recompute cheap activation and normalize; NCHW-flat (N, Cout, HW) output ---
    out = pl.pallas_call(
        functools.partial(_norm_kernel, nb=NB, wp=Wp, hw=HW),
        grid=(G,),
        in_specs=[
            pl.BlockSpec((NB, 8, Lf), lambda g: (g, 0, 0)),
            pl.BlockSpec((4, Cout, 16), lambda g: (0, 0, 0)),
            pl.BlockSpec((Cout, 1), lambda g: (0, 0)),
            pl.BlockSpec((Cout, 1), lambda g: (0, 0)),
            pl.BlockSpec((Cout, 1), lambda g: (0, 0)),
        ],
        out_specs=pl.BlockSpec((NB, Cout, HW), lambda g: (g, 0, 0)),
        out_shape=jax.ShapeDtypeStruct((N, Cout, HW), jnp.float32),
        compiler_params=parallel1,
    )(pf, wmat, bias, mean.reshape(Cout, 1), invstd.reshape(Cout, 1))

    # contiguous (free) reshape to PyTorch NCHW
    return out.reshape(N, Cout, Hp, Wp)


def neta_reference(x, conv_w, conv_b):
    """Pure-JAX reference of the PyTorch forward (training-mode batchnorm)."""
    conv = jax.lax.conv_general_dilated(
        x, conv_w, window_strides=(1, 1), padding=((1, 1), (1, 1)),
        dimension_numbers=("NCHW", "OIHW", "NCHW"),
    ) + conv_b.reshape(1, -1, 1, 1)
    pool = jax.lax.reduce_window(
        conv, -jnp.inf, jax.lax.max, (1, 1, 2, 2), (1, 1, 2, 2), "VALID"
    )
    act = jnp.maximum(pool, 0.0)
    mean = jnp.mean(act, axis=(0, 2, 3), keepdims=True)
    var = jnp.mean((act - mean) ** 2, axis=(0, 2, 3), keepdims=True)
    return (act - mean) * jax.lax.rsqrt(var + EPS)


if __name__ == "__main__":
    key = jax.random.PRNGKey(0)
    kx, kw, kb = jax.random.split(key, 3)

    # Small shapes consistent with the module: conv expects 1 input channel.
    x = jax.random.normal(kx, (2, 1, 16, 16), dtype=jnp.float32)
    conv_w = jax.random.normal(kw, (30, 1, 3, 3), dtype=jnp.float32) * (1.0 / 3.0)
    conv_b = jax.random.normal(kb, (30,), dtype=jnp.float32) * 0.1

    out = jax.jit(neta_forward)(x, conv_w, conv_b)
    out = jax.block_until_ready(out)

    ref = neta_reference(x, conv_w, conv_b)
    assert out.shape == (2, 30, 8, 8), out.shape
    np.testing.assert_allclose(np.asarray(out), np.asarray(ref), rtol=2e-4, atol=2e-4)

    print("KERNEL_OK")
</pallas_src>

<mosaic_0001>
module attributes {stable_mosaic.version = 11 : i64} {
  func.func @_norm_kernel(%arg0: i32, %arg1: memref<1x8x72xf32, #tpu.memory_space<vmem>>, %arg2: memref<4x30x16xf32, #tpu.memory_space<vmem>>, %arg3: memref<30x1xf32, #tpu.memory_space<vmem>>, %arg4: memref<30x1xf32, #tpu.memory_space<vmem>>, %arg5: memref<30x1xf32, #tpu.memory_space<vmem>>, %arg6: memref<1x30x64xf32, #tpu.memory_space<vmem>>) attributes {dimension_semantics = [#tpu.dimension_semantics<parallel>], iteration_bounds = array<i64: 2>, scalar_prefetch = 0 : i64, scratch_operands = 0 : i64, tpu.core_type = #tpu.core_type<tc>, window_params = [{transform_indices = @transform_0, window_bounds = array<i64: 1, 8, 72>}, {pipeline_mode = #tpu.pipeline_mode<synchronous>, transform_indices = @transform_1, window_bounds = array<i64: 4, 30, 16>}, {pipeline_mode = #tpu.pipeline_mode<synchronous>, transform_indices = @transform_2, window_bounds = array<i64: 30, 1>}, {pipeline_mode = #tpu.pipeline_mode<synchronous>, transform_indices = @transform_3, window_bounds = array<i64: 30, 1>}, {pipeline_mode = #tpu.pipeline_mode<synchronous>, transform_indices = @transform_4, window_bounds = array<i64: 30, 1>}, {transform_indices = @transform_5, window_bounds = array<i64: 1, 30, 64>}]} {
    %c0 = arith.constant 0 : index
    %c0_0 = arith.constant 0 : index
    %c0_1 = arith.constant 0 : index
    %0 = vector.load %arg2[%c0, %c0_0, %c0_1] : memref<4x30x16xf32, #tpu.memory_space<vmem>>, vector<4x30x16xf32>
    %c0_2 = arith.constant 0 : index
    %c0_3 = arith.constant 0 : index
    %1 = vector.load %arg3[%c0_2, %c0_3] : memref<30x1xf32, #tpu.memory_space<vmem>>, vector<30x1xf32>
    %c0_4 = arith.constant 0 : index
    %c0_5 = arith.constant 0 : index
    %2 = vector.load %arg4[%c0_4, %c0_5] : memref<30x1xf32, #tpu.memory_space<vmem>>, vector<30x1xf32>
    %c0_6 = arith.constant 0 : index
    %c0_7 = arith.constant 0 : index
    %3 = vector.load %arg5[%c0_6, %c0_7] : memref<30x1xf32, #tpu.memory_space<vmem>>, vector<30x1xf32>
    %c0_i32 = arith.constant 0 : i32
    %4 = arith.index_cast %c0_i32 : i32 to index
    %c0_8 = arith.constant 0 : index
    %c0_9 = arith.constant 0 : index
    %5 = vector.load %arg1[%4, %c0_8, %c0_9] : memref<1x8x72xf32, #tpu.memory_space<vmem>>, vector<1x8x72xf32>
    %6 = vector.shape_cast %5 : vector<1x8x72xf32> to vector<8x72xf32>
    %7 = vector.extract_strided_slice %6 {offsets = [0, 0], sizes = [8, 64], strides = [1, 1]} : vector<8x72xf32> to vector<8x64xf32>
    %8 = vector.extract_strided_slice %6 {offsets = [0, 8], sizes = [8, 64], strides = [1, 1]} : vector<8x72xf32> to vector<8x64xf32>
    %9 = tpu.concatenate %7, %8 in 0 : vector<8x64xf32>, vector<8x64xf32> -> vector<16x64xf32>
    %10 = vector.extract_strided_slice %0 {offsets = [0, 0, 0], sizes = [1, 30, 16], strides = [1, 1, 1]} : vector<4x30x16xf32> to vector<1x30x16xf32>
    %11 = vector.shape_cast %10 : vector<1x30x16xf32> to vector<30x16xf32>
    %cst = arith.constant dense<0.000000e+00> : vector<30x64xf32>
    %12 = tpu.matmul %11, %9, %cst {dimension_numbers = #tpu.dot_dimension_numbers<[1], [0], [0], [1], [0, 0, 1, 1], [], []>} : vector<30x16xf32>, vector<16x64xf32>, vector<30x64xf32> -> vector<30x64xf32>
    %13 = vector.extract_strided_slice %0 {offsets = [1, 0, 0], sizes = [1, 30, 16], strides = [1, 1, 1]} : vector<4x30x16xf32> to vector<1x30x16xf32>
    %14 = vector.shape_cast %13 : vector<1x30x16xf32> to vector<30x16xf32>
    %cst_10 = arith.constant dense<0.000000e+00> : vector<30x64xf32>
    %15 = tpu.matmul %14, %9, %cst_10 {dimension_numbers = #tpu.dot_dimension_numbers<[1], [0], [0], [1], [0, 0, 1, 1], [], []>} : vector<30x16xf32>, vector<16x64xf32>, vector<30x64xf32> -> vector<30x64xf32>
    %16 = arith.maximumf %12, %15 : vector<30x64xf32>
    %17 = vector.extract_strided_slice %0 {offsets = [2, 0, 0], sizes = [1, 30, 16], strides = [1, 1, 1]} : vector<4x30x16xf32> to vector<1x30x16xf32>
    %18 = vector.shape_cast %17 : vector<1x30x16xf32> to vector<30x16xf32>
    %cst_11 = arith.constant dense<0.000000e+00> : vector<30x64xf32>
    %19 = tpu.matmul %18, %9, %cst_11 {dimension_numbers = #tpu.dot_dimension_numbers<[1], [0], [0], [1], [0, 0, 1, 1], [], []>} : vector<30x16xf32>, vector<16x64xf32>, vector<30x64xf32> -> vector<30x64xf32>
    %20 = arith.maximumf %16, %19 : vector<30x64xf32>
    %21 = vector.extract_strided_slice %0 {offsets = [3, 0, 0], sizes = [1, 30, 16], strides = [1, 1, 1]} : vector<4x30x16xf32> to vector<1x30x16xf32>
    %22 = vector.shape_cast %21 : vector<1x30x16xf32> to vector<30x16xf32>
    %cst_12 = arith.constant dense<0.000000e+00> : vector<30x64xf32>
    %23 = tpu.matmul %22, %9, %cst_12 {dimension_numbers = #tpu.dot_dimension_numbers<[1], [0], [0], [1], [0, 0, 1, 1], [], []>} : vector<30x16xf32>, vector<16x64xf32>, vector<30x64xf32> -> vector<30x64xf32>
    %24 = arith.maximumf %20, %23 : vector<30x64xf32>
    %25 = vector.broadcast %1 : vector<30x1xf32> to vector<30x64xf32>
    %26 = arith.addf %24, %25 : vector<30x64xf32>
    %cst_13 = arith.constant 0.000000e+00 : f32
    %27 = vector.broadcast %cst_13 : f32 to vector<30x64xf32>
    %28 = arith.maximumf %26, %27 : vector<30x64xf32>
    %29 = vector.broadcast %2 : vector<30x1xf32> to vector<30x64xf32>
    %30 = arith.subf %28, %29 : vector<30x64xf32>
    %31 = vector.broadcast %3 : vector<30x1xf32> to vector<30x64xf32>
    %32 = arith.mulf %30, %31 : vector<30x64xf32>
    %33 = arith.index_cast %c0_i32 : i32 to index
    %c0_14 = arith.constant 0 : index
    %c0_15 = arith.constant 0 : index
    %34 = vector.load %arg6[%33, %c0_14, %c0_15] : memref<1x30x64xf32, #tpu.memory_space<vmem>>, vector<1x30x64xf32>
    %35 = vector.shape_cast %34 : vector<1x30x64xf32> to vector<30x64xf32>
    %36 = vector.shape_cast %32 : vector<30x64xf32> to vector<1x30x64xf32>
    tpu.vector_store %arg6[%33, %c0_14, %c0_15], %36 {strides = array<i32>} : memref<1x30x64xf32, #tpu.memory_space<vmem>>, vector<1x30x64xf32>,
    %c1_i32 = arith.constant 1 : i32
    return
  }
  func.func @transform_0(%arg0: i32) -> (i32, i32, i32) {
    %c0_i32 = arith.constant 0 : i32
    %c0_i32_0 = arith.constant 0 : i32
    %c0_i32_1 = arith.constant 0 : i32
    return %arg0, %c0_i32, %c0_i32_0 : i32, i32, i32
  }
  func.func @transform_1(%arg0: i32) -> (i32, i32, i32) {
    %c0_i32 = arith.constant 0 : i32
    %c0_i32_0 = arith.constant 0 : i32
    %c0_i32_1 = arith.constant 0 : i32
    %c0_i32_2 = arith.constant 0 : i32
    return %c0_i32, %c0_i32_0, %c0_i32_1 : i32, i32, i32
  }
  func.func @transform_2(%arg0: i32) -> (i32, i32) {
    %c0_i32 = arith.constant 0 : i32
    %c0_i32_0 = arith.constant 0 : i32
    %c0_i32_1 = arith.constant 0 : i32
    return %c0_i32, %c0_i32_0 : i32, i32
  }
  func.func @transform_3(%arg0: i32) -> (i32, i32) {
    %c0_i32 = arith.constant 0 : i32
    %c0_i32_0 = arith.constant 0 : i32
    %c0_i32_1 = arith.constant 0 : i32
    return %c0_i32, %c0_i32_0 : i32, i32
  }
  func.func @transform_4(%arg0: i32) -> (i32, i32) {
    %c0_i32 = arith.constant 0 : i32
    %c0_i32_0 = arith.constant 0 : i32
    %c0_i32_1 = arith.constant 0 : i32
    return %c0_i32, %c0_i32_0 : i32, i32
  }
  func.func @transform_5(%arg0: i32) -> (i32, i32, i32) {
    %c0_i32 = arith.constant 0 : i32
    %c0_i32_0 = arith.constant 0 : i32
    %c0_i32_1 = arith.constant 0 : i32
    return %arg0, %c0_i32, %c0_i32_0 : i32, i32, i32
  }
}

module attributes {stable_mosaic.version = 11 : i64} {
  func.func @_stats_kernel(%arg0: i32, %arg1: memref<1x8x72xf32, #tpu.memory_space<vmem>>, %arg2: memref<4x30x16xf32, #tpu.memory_space<vmem>>, %arg3: memref<30x1xf32, #tpu.memory_space<vmem>>, %arg4: memref<1x2x30xf32, #tpu.memory_space<vmem>>) attributes {dimension_semantics = [#tpu.dimension_semantics<parallel>], iteration_bounds = array<i64: 2>, scalar_prefetch = 0 : i64, scratch_operands = 0 : i64, tpu.core_type = #tpu.core_type<tc>, window_params = [{transform_indices = @transform_0, window_bounds = array<i64: 1, 8, 72>}, {pipeline_mode = #tpu.pipeline_mode<synchronous>, transform_indices = @transform_1, window_bounds = array<i64: 4, 30, 16>}, {pipeline_mode = #tpu.pipeline_mode<synchronous>, transform_indices = @transform_2, window_bounds = array<i64: 30, 1>}, {transform_indices = @transform_3, window_bounds = array<i64: 1, 2, 30>}]} {
    %c0 = arith.constant 0 : index
    %c0_0 = arith.constant 0 : index
    %c0_1 = arith.constant 0 : index
    %0 = vector.load %arg2[%c0, %c0_0, %c0_1] : memref<4x30x16xf32, #tpu.memory_space<vmem>>, vector<4x30x16xf32>
    %c0_2 = arith.constant 0 : index
    %c0_3 = arith.constant 0 : index
    %1 = vector.load %arg3[%c0_2, %c0_3] : memref<30x1xf32, #tpu.memory_space<vmem>>, vector<30x1xf32>
    %cst = arith.constant 0.000000e+00 : f32
    %2 = vector.broadcast %cst : f32 to vector<30xf32>
    %c0_i32 = arith.constant 0 : i32
    %3 = arith.index_cast %c0_i32 : i32 to index
    %c0_4 = arith.constant 0 : index
    %c0_5 = arith.constant 0 : index
    %4 = vector.load %arg1[%3, %c0_4, %c0_5] : memref<1x8x72xf32, #tpu.memory_space<vmem>>, vector<1x8x72xf32>
    %5 = vector.shape_cast %4 : vector<1x8x72xf32> to vector<8x72xf32>
    %6 = vector.extract_strided_slice %5 {offsets = [0, 0], sizes = [8, 64], strides = [1, 1]} : vector<8x72xf32> to vector<8x64xf32>
    %7 = vector.extract_strided_slice %5 {offsets = [0, 8], sizes = [8, 64], strides = [1, 1]} : vector<8x72xf32> to vector<8x64xf32>
    %8 = tpu.concatenate %6, %7 in 0 : vector<8x64xf32>, vector<8x64xf32> -> vector<16x64xf32>
    %9 = vector.extract_strided_slice %0 {offsets = [0, 0, 0], sizes = [1, 30, 16], strides = [1, 1, 1]} : vector<4x30x16xf32> to vector<1x30x16xf32>
    %10 = vector.shape_cast %9 : vector<1x30x16xf32> to vector<30x16xf32>
    %cst_6 = arith.constant dense<0.000000e+00> : vector<30x64xf32>
    %11 = tpu.matmul %10, %8, %cst_6 {dimension_numbers = #tpu.dot_dimension_numbers<[1], [0], [0], [1], [0, 0, 1, 1], [], []>} : vector<30x16xf32>, vector<16x64xf32>, vector<30x64xf32> -> vector<30x64xf32>
    %12 = vector.extract_strided_slice %0 {offsets = [1, 0, 0], sizes = [1, 30, 16], strides = [1, 1, 1]} : vector<4x30x16xf32> to vector<1x30x16xf32>
    %13 = vector.shape_cast %12 : vector<1x30x16xf32> to vector<30x16xf32>
    %cst_7 = arith.constant dense<0.000000e+00> : vector<30x64xf32>
    %14 = tpu.matmul %13, %8, %cst_7 {dimension_numbers = #tpu.dot_dimension_numbers<[1], [0], [0], [1], [0, 0, 1, 1], [], []>} : vector<30x16xf32>, vector<16x64xf32>, vector<30x64xf32> -> vector<30x64xf32>
    %15 = arith.maximumf %11, %14 : vector<30x64xf32>
    %16 = vector.extract_strided_slice %0 {offsets = [2, 0, 0], sizes = [1, 30, 16], strides = [1, 1, 1]} : vector<4x30x16xf32> to vector<1x30x16xf32>
    %17 = vector.shape_cast %16 : vector<1x30x16xf32> to vector<30x16xf32>
    %cst_8 = arith.constant dense<0.000000e+00> : vector<30x64xf32>
    %18 = tpu.matmul %17, %8, %cst_8 {dimension_numbers = #tpu.dot_dimension_numbers<[1], [0], [0], [1], [0, 0, 1, 1], [], []>} : vector<30x16xf32>, vector<16x64xf32>, vector<30x64xf32> -> vector<30x64xf32>
    %19 = arith.maximumf %15, %18 : vector<30x64xf32>
    %20 = vector.extract_strided_slice %0 {offsets = [3, 0, 0], sizes = [1, 30, 16], strides = [1, 1, 1]} : vector<4x30x16xf32> to vector<1x30x16xf32>
    %21 = vector.shape_cast %20 : vector<1x30x16xf32> to vector<30x16xf32>
    %cst_9 = arith.constant dense<0.000000e+00> : vector<30x64xf32>
    %22 = tpu.matmul %21, %8, %cst_9 {dimension_numbers = #tpu.dot_dimension_numbers<[1], [0], [0], [1], [0, 0, 1, 1], [], []>} : vector<30x16xf32>, vector<16x64xf32>, vector<30x64xf32> -> vector<30x64xf32>
    %23 = arith.maximumf %19, %22 : vector<30x64xf32>
    %24 = vector.broadcast %1 : vector<30x1xf32> to vector<30x64xf32>
    %25 = arith.addf %23, %24 : vector<30x64xf32>
    %cst_10 = arith.constant 0.000000e+00 : f32
    %26 = vector.broadcast %cst_10 : f32 to vector<30x64xf32>
    %27 = arith.maximumf %25, %26 : vector<30x64xf32>
    %cst_11 = arith.constant dense<0.000000e+00> : vector<30xf32>
    %28 = vector.multi_reduction <add>, %27, %cst_11 [1] : vector<30x64xf32> to vector<30xf32>
    %29 = arith.addf %2, %28 : vector<30xf32>
    %30 = arith.mulf %27, %27 : vector<30x64xf32>
    %cst_12 = arith.constant dense<0.000000e+00> : vector<30xf32>
    %31 = vector.multi_reduction <add>, %30, %cst_12 [1] : vector<30x64xf32> to vector<30xf32>
    %32 = arith.addf %2, %31 : vector<30xf32>
    %c1_i32 = arith.constant 1 : i32
    %c0_13 = arith.constant 0 : index
    %c0_14 = arith.constant 0 : index
    %c0_15 = arith.constant 0 : index
    %33 = vector.load %arg4[%c0_13, %c0_14, %c0_15] : memref<1x2x30xf32, #tpu.memory_space<vmem>>, vector<1x1x30xf32>
    %34 = vector.shape_cast %33 : vector<1x1x30xf32> to vector<30xf32>
    %35 = vector.shape_cast %29 : vector<30xf32> to vector<1x1x30xf32>
    tpu.vector_store %arg4[%c0_13, %c0_14, %c0_15], %35 {strides = array<i32>} : memref<1x2x30xf32, #tpu.memory_space<vmem>>, vector<1x1x30xf32>,
    %c0_16 = arith.constant 0 : index
    %c1 = arith.constant 1 : index
    %c0_17 = arith.constant 0 : index
    %36 = vector.load %arg4[%c0_16, %c1, %c0_17] : memref<1x2x30xf32, #tpu.memory_space<vmem>>, vector<1x1x30xf32>
    %37 = vector.shape_cast %36 : vector<1x1x30xf32> to vector<30xf32>
    %38 = vector.shape_cast %32 : vector<30xf32> to vector<1x1x30xf32>
    tpu.vector_store %arg4[%c0_16, %c1, %c0_17], %38 {strides = array<i32>} : memref<1x2x30xf32, #tpu.memory_space<vmem>>, vector<1x1x30xf32>,
    return
  }
  func.func @transform_0(%arg0: i32) -> (i32, i32, i32) {
    %c0_i32 = arith.constant 0 : i32
    %c0_i32_0 = arith.constant 0 : i32
    %c0_i32_1 = arith.constant 0 : i32
    return %arg0, %c0_i32, %c0_i32_0 : i32, i32, i32
  }
  func.func @transform_1(%arg0: i32) -> (i32, i32, i32) {
    %c0_i32 = arith.constant 0 : i32
    %c0_i32_0 = arith.constant 0 : i32
    %c0_i32_1 = arith.constant 0 : i32
    %c0_i32_2 = arith.constant 0 : i32
    return %c0_i32, %c0_i32_0, %c0_i32_1 : i32, i32, i32
  }
  func.func @transform_2(%arg0: i32) -> (i32, i32) {
    %c0_i32 = arith.constant 0 : i32
    %c0_i32_0 = arith.constant 0 : i32
    %c0_i32_1 = arith.constant 0 : i32
    return %c0_i32, %c0_i32_0 : i32, i32
  }
  func.func @transform_3(%arg0: i32) -> (i32, i32, i32) {
    %c0_i32 = arith.constant 0 : i32
    %c0_i32_0 = arith.constant 0 : i32
    %c0_i32_1 = arith.constant 0 : i32
    return %arg0, %c0_i32, %c0_i32_0 : i32, i32, i32
  }
}

</mosaic_0001>

<bundles_post_ra>
// kernel: neta_forward.3
= control target key start
LH: loop header
LB: loop body
LE: loop exit
PB: predicated region body
PF: predicated region fallthrough
CT: control target
= control target key end

     0   :  { %s952_s18 = smov 0   ;;  %s1076_s0 = inlined_call_operand.vmem [shape: f32[2,8,72], index: 0, kind: input, shape index: {}]   ;;  %s1077_s1 = inlined_call_operand.vmem [shape: f32[4,30,16], index: 1, kind: input, shape index: {}]   ;;  %s1078_s2 = inlined_call_operand.vmem [shape: f32[30,1], index: 2, kind: input, shape index: {}]   ;;  %s1079_s3 = inlined_call_operand.vmem [shape: f32[30,1], index: 3, kind: input, shape index: {}]   ;;  %s1080_s4 = inlined_call_operand.vmem [shape: f32[30,1], index: 4, kind: input, shape index: {}]   ;;  %s1081_s5 = inlined_call_operand.vmem [shape: f32[2,30,64], index: 5, kind: output, shape index: {}]  }
   0x1 LB: > { %s793_s19 = sadd.s32 4294967295, %s918_s18   ;;  %p797_p0 = scmp.ge.s32.totalorder %s918_s18, 1  ;;  %s918_s18 = sphi %s952_s18, %s15_s18  }
   0x2   : > { %p186_p1 = scmp.lt.s32.totalorder %s918_s18, 3 }
   0x4   : > { %p187_p2 = pnand %p797_p0, %p186_p1 }
   0x5   : > { %p213_p3 = scmp.lt.s32.totalorder (!%p187_p2), %s793_s19, 1  ;;  %v222_v0 = vld [vmem:[%s1077_s1] sm:$0xff] (!%p187_p2)  ;;  %vm255_vm0 = vcmask (!%p187_p2), 130048   ;;  %s920_s28 = smov (!%p187_p2), 120   ;;  %v239_v3 = vld [vmem:[%s1078_s2 + $0x8] sm:$0xff] (!%p187_p2)  ;;  %v921_v4 = vmov (!%p187_p2), 0  }
   0x6   : > { %190 = sbr.rel (%p187_p2) target bundleno = 376 (0x178), region = 40  ;;  %v226_v1 = vld [vmem:[%s1077_s1 + $0x20] sm:$0xff] (!%p187_p2)  ;;  %848 = vmatprep.mubr.msk.f32.mxu0 (!%p187_p2), %vm255_vm0, %v222_v0  ;;  %911 = vset.pattern.permute.xlu1 (!%p187_p2), %v921_v4  ;;  %v240_v6 = vld [vmem:[%s1078_s2 + $0x10] sm:$0xff] (!%p187_p2)  ;;  %v241_v8 = vld [vmem:[%s1078_s2 + $0x18] sm:$0x3f] (!%p187_p2)  ;;  %vm732_vm1 = vcmask (!%p187_p2), 523264  }
   0x7   : > { %858 = vmatprep.mubr.msk.f32.mxu1 (!%p187_p2), %vm255_vm0, %v226_v1  ;;  %910 = vset.pattern.permute.xlu0 (!%p187_p2), %v921_v4  ;;  %v238_v5 = vld [vmem:[%s1078_s2] sm:$0xff] (!%p187_p2)  ;;  %v244_v9 = vld [vmem:[%s1079_s3 + $0x10] sm:$0xff] (!%p187_p2)  ;;  %v243_v10 = vld [vmem:[%s1079_s3 + $0x8] sm:$0xff] (!%p187_p2)  ;;  %vm736_vm2 = vcmask (!%p187_p2), 521216  }
   0x8   : > { %663 = vperm.xlu1 (!%p187_p2), %911, %v239_v3   ;;  %v242_v7 = vld [vmem:[%s1079_s3] sm:$0xff] (!%p187_p2)  ;;  %v245_v12 = vld [vmem:[%s1079_s3 + $0x18] sm:$0x3f] (!%p187_p2)  ;;  %v248_v13 = vld [vmem:[%s1080_s4 + $0x10] sm:$0xff] (!%p187_p2) }
   0x9   : > { %v246_v11 = vld [vmem:[%s1080_s4] sm:$0xff] (!%p187_p2)  ;;  %v247_v14 = vld [vmem:[%s1080_s4 + $0x8] sm:$0xff] (!%p187_p2)  ;;  %v249_v15 = vld [vmem:[%s1080_s4 + $0x18] sm:$0x3f] (!%p187_p2) }
   0xa   : > { %v223_v18 = vld [vmem:[%s1077_s1 + $0x8] sm:$0xff] (!%p187_p2)  ;;  %v224_v20 = vld [vmem:[%s1077_s1 + $0x10] sm:$0xff] (!%p187_p2)  ;;  %v225_v22 = vld [vmem:[%s1077_s1 + $0x18] sm:$0x3f] (!%p187_p2) }
   0xb   : > { %v227_v19 = vld [vmem:[%s1077_s1 + $0x28] sm:$0xff] (!%p187_p2)  ;;  %v228_v21 = vld [vmem:[%s1077_s1 + $0x30] sm:$0xff] (!%p187_p2)  ;;  %v229_v23 = vld [vmem:[%s1077_s1 + $0x38] sm:$0x3f] (!%p187_p2) }
   0xc   : > { %668 = vperm.xlu1 (!%p187_p2), %911, %v240_v6   ;;  %v230_v24 = vld [vmem:[%s1077_s1 + $0x40] sm:$0xff] (!%p187_p2)  ;;  %v231_v26 = vld [vmem:[%s1077_s1 + $0x48] sm:$0xff] (!%p187_p2)  ;;  %v232_v28 = vld [vmem:[%s1077_s1 + $0x50] sm:$0xff] (!%p187_p2) }
   0xd   : > { %s1083_s19 = smov (!%p213_p3, %s793_s19), 1  ;;  %v234_v25 = vld [vmem:[%s1077_s1 + $0x60] sm:$0xff]  ;;  %v235_v27 = vld [vmem:[%s1077_s1 + $0x68] sm:$0xff]  ;;  %v236_v29 = vld [vmem:[%s1077_s1 + $0x70] sm:$0xff] }
   0xe   : > { %s798_s24 = sshll.u32 %s1083_s19, 3  ;;  %v233_v30 = vld [vmem:[%s1077_s1 + $0x58] sm:$0x3f]  ;;  %s819_s10 = sshll.u32 %s1083_s19, 5 }
   0xf   : > { %s216_s27 = scalar_lea.vmem %s1076_s0, %s798_s24  ;;  %v237_v31 = vld [vmem:[%s1077_s1 + $0x78] sm:$0x3f]  ;;  %s221_s13 = scalar_lea.vmem %s1081_s5, %s819_s10 }
  0x10   : > { %v250_v2 = vld [vmem:[%s216_s27] sm:$0xff]  ;;  %673 = vperm.xlu1 %911, %v241_v8  }
  0x11   : > { %252 = vrot.lane.b32.xlu0 %v250_v2, %s920_s28 }
  0x14   : > { %691 = vperm.xlu1 %911, %v243_v10  }
  0x15   : > { %658 = vperm.xlu0 %910, %v238_v5  }
  0x18   : > { %701 = vperm.xlu1 %911, %v245_v12  }
  0x19   : > { %686 = vperm.xlu0 %910, %v242_v7  }
  0x1c   : > { %715 = vperm.xlu1 %911, %v247_v14  }
  0x1d   : > { %696 = vperm.xlu0 %910, %v244_v9  }
  0x20   : > { %725 = vperm.xlu1 %911, %v249_v15  }
  0x21   : > { %710 = vperm.xlu0 %910, %v246_v11  }
  0x25   : > { %720 = vperm.xlu0 %910, %v248_v13  }
  0x83   : > { %v253_v16 = vpop.permute.xlu0 %252 }
  0x84   : > { %v884_v17 = vpack.c.bf16 %v253_v16, %v250_v2 }
  0x86   : > { %885 = vmatprep.subr.bf16.mxu0 %v884_v17  ;;  %889 = vmatprep.subr.bf16.mxu1 %v884_v17 }
  0x87   : > { %887 = vmatpush3.bf16.msra.mxu0 %v884_v17  ;;  %891 = vmatpush3.bf16.msra.mxu1 %v884_v17  ;;  %v664_v32 = vpop.permute.xlu1 %663 }
  0x88   : > { %893 = vmatprep.subr.bf16.mxu0 %v884_v17  ;;  %897 = vmatprep.subr.bf16.mxu1 %v884_v17 }
  0x8a   : > { %849 = vmatmul.mubr.msk.f32.vlgmr.msra.gmra.mrb[0].mxu0 %vm255_vm0, %v223_v18  ;;  %859 = vmatmul.mubr.msk.f32.vlgmr.msra.gmra.mrb[0].mxu1 %vm255_vm0, %v227_v19 }
  0x8b   : > { %895 = vmatpush3.bf16.msra.mxu0 %v884_v17  ;;  %899 = vmatpush3.bf16.msra.mxu1 %v884_v17  ;;  %v669_v33 = vpop.permute.xlu1 %668 }
  0x8c   : > { %851 = vmatprep.mubr.msk.f32.mxu0 %vm255_vm0, %v224_v20  ;;  %861 = vmatprep.mubr.msk.f32.mxu1 %vm255_vm0, %v228_v21 }
  0x8e   : > { %852 = vmatmul.mubr.msk.f32.gmra.mrb[2].mxu0 %vm255_vm0, %v225_v22  ;;  %862 = vmatmul.mubr.msk.f32.gmra.mrb[2].mxu1 %vm255_vm0, %v229_v23 }
  0x8f   : > { %868 = vmatprep.mubr.msk.f32.mxu0 %vm255_vm0, %v230_v24  ;;  %878 = vmatprep.mubr.msk.f32.mxu1 %vm255_vm0, %v234_v25  ;;  %v674_v34 = vpop.permute.xlu1 %673 }
  0x92   : > { %869 = vmatmul.mubr.msk.f32.vlgmr.msra.gmra.mrb[4].mxu0 %vm255_vm0, %v231_v26  ;;  %879 = vmatmul.mubr.msk.f32.vlgmr.msra.gmra.mrb[4].mxu1 %vm255_vm0, %v235_v27 }
  0x93   : > { %871 = vmatprep.mubr.msk.f32.mxu0 %vm255_vm0, %v232_v28  ;;  %881 = vmatprep.mubr.msk.f32.mxu1 %vm255_vm0, %v236_v29  ;;  %v692_v42 = vpop.permute.xlu1 %691 }
  0x94   : > { %v659_v35 = vpop.permute.xlu0 %658 }
  0x96   : > { %872 = vmatmul.mubr.msk.f32.gmra.mrb[6].mxu0 %vm255_vm0, %v233_v30  ;;  %882 = vmatmul.mubr.msk.f32.gmra.mrb[6].mxu1 %vm255_vm0, %v237_v31 }
  0x97   : > { %v702_v55 = vpop.permute.xlu1 %701 }
  0x98   : > { %v687_v43 = vpop.permute.xlu0 %686 }
  0x9b   : > { %v716_v6 = vpop.permute.xlu1 %715 }
  0x9c   : > { %v697_v57 = vpop.permute.xlu0 %696 }
  0x9f   : > { %v726_v19 = vpop.permute.xlu1 %725 }
  0xa0   : > { %v711_v9 = vpop.permute.xlu0 %710 }
  0xa4   : > { %v721_v21 = vpop.permute.xlu0 %720 }
 0x15d   : > { %v850_v36 = vpop.f32.mrb[0].mxu0  ;;  %v860_v37 = vpop.f32.mrb[0].mxu1 }
 0x15e   : > { %v451_v38 = vmax.f32 %v850_v36, %v860_v37  ;;  %v334_v39 = vpop.f32.mrb[1].mxu0  ;;  %v431_v40 = vpop.f32.mrb[1].mxu1 }
 0x15f   : > { %v450_v41 = vmax.f32 %v334_v39, %v431_v40 }
 0x161   : > { %v853_v44 = vpop.f32.mrb[2].mxu0  ;;  %v863_v45 = vpop.f32.mrb[2].mxu1 }
 0x162   : > { %v453_v46 = vmax.f32 %v853_v44, %v863_v45  ;;  %v344_v47 = vpop.f32.mrb[3].mxu0  ;;  %v441_v48 = vpop.f32.mrb[3].mxu1 }
 0x163   : > { %v452_v49 = vmax.f32 %v344_v47, %v441_v48 }
 0x165   : > { %v870_v50 = vpop.f32.mrb[4].mxu0  ;;  %v880_v51 = vpop.f32.mrb[4].mxu1 }
 0x166   : > { %v552_v52 = vmax.f32 %v451_v38, %v870_v50  ;;  %v532_v53 = vpop.f32.mrb[5].mxu0  ;;  %v633_v54 = vpop.f32.mrb[5].mxu1 }
 0x167   : > { %v551_v56 = vmax.f32 %v450_v41, %v532_v53 }
 0x168   : > { %v653_v58 = vmax.f32 %v552_v52, %v880_v51 }
 0x169   : > { %v652_v59 = vmax.f32 %v551_v56, %v633_v54  ;;  %v873_v60 = vpop.f32.mrb[6].mxu0  ;;  %v883_v61 = vpop.f32.mrb[6].mxu1 }
 0x16a   : > { %v677_v62 = vadd.f32 %v664_v32, %v653_v58  ;;  %v554_v63 = vmax.f32 %v453_v46, %v873_v60  ;;  %v542_v0 = vpop.f32.mrb[7].mxu0  ;;  %v643_v1 = vpop.f32.mrb[7].mxu1 }
 0x16b   : > { %v676_v2 = vadd.f32 %v659_v35, %v652_v59  ;;  %v553_v3 = vmax.f32 %v452_v49, %v542_v0 }
 0x16c   : > { %v681_v4 = vmax.f32 %v677_v62, 0.0  ;;  %v655_v5 = vmax.f32 %v554_v63, %v883_v61 }
 0x16d   : > { %v680_v7 = vmax.f32 %v676_v2, 0.0  ;;  %v654_v8 = vmax.f32 %v553_v3, %v643_v1 }
 0x16e   : > { %v705_v10 = vsub.f32 %v681_v4, %v692_v42  ;;  %v679_v11 = vadd.f32 %v674_v34, %v655_v5 }
 0x16f   : > { %v704_v12 = vsub.f32 %v680_v7, %v687_v43  ;;  %v678_v13 = vadd.f32 %v669_v33, %v654_v8 }
 0x170   : > { %v729_v14 = vmul.f32 %v716_v6, %v705_v10  ;;  %v683_v15 = vmax.f32 %v679_v11, 0.0 }
 0x171   : > { %v728_v16 = vmul.f32 %v711_v9, %v704_v12  ;;  %v682_v17 = vmax.f32 %v678_v13, 0.0 }
 0x172   : > { %734 = vst.msk [vmem:[%s221_s13 + $0x8] sm:$0xff] %vm732_vm1, %v729_v14  ;;  %v707_v18 = vsub.f32 %v683_v15, %v702_v55 }
 0x173   : > { %733 = vst.msk [vmem:[%s221_s13] sm:$0xff] %vm732_vm1, %v728_v16  ;;  %v706_v20 = vsub.f32 %v682_v17, %v697_v57 }
 0x174   : > { %v731_v22 = vmul.f32 %v726_v19, %v707_v18 }
 0x175   : > { %v730_v23 = vmul.f32 %v721_v21, %v706_v20 }
 0x176   : > { %737 = vst.msk [vmem:[%s221_s13 + $0x18] sm:$0x3f] %vm736_vm2, %v731_v22 }
 0x177   : > { %735 = vst.msk [vmem:[%s221_s13 + $0x10] sm:$0xff] %vm732_vm1, %v730_v23 }
 0x178 PF: > { %s15_s18 = sadd.s32 1, %s918_s18  }
 0x179   : > { %p12_p4 = scmp.ge.s32.totalorder %s15_s18, 4  }
 0x17b   :  { %14 = sbr.rel (!%p12_p4) target bundleno = 1 (0x1), region = 70 }

// kernel: neta_forward.2
= control target key start
LH: loop header
LB: loop body
LE: loop exit
PB: predicated region body
PF: predicated region fallthrough
CT: control target
= control target key end

     0   :  { %s917_s12 = smov 0   ;;  %s1026_s0 = inlined_call_operand.vmem [shape: f32[2,8,72], index: 0, kind: input, shape index: {}]   ;;  %s1027_s1 = inlined_call_operand.vmem [shape: f32[4,30,16], index: 1, kind: input, shape index: {}]   ;;  %s1028_s2 = inlined_call_operand.vmem [shape: f32[30,1], index: 2, kind: input, shape index: {}]   ;;  %s1029_s3 = inlined_call_operand.vmem [shape: f32[2,2,30], index: 3, kind: output, shape index: {}]  }
   0x1 LB: > { %s770_s13 = sadd.s32 4294967295, %s893_s12   ;;  %p774_p0 = scmp.ge.s32.totalorder %s893_s12, 1  ;;  %s893_s12 = sphi %s917_s12, %s13_s12  }
   0x2   : > { %p136_p1 = scmp.lt.s32.totalorder %s893_s12, 3 }
   0x4   : > { %p137_p2 = pnand %p774_p0, %p136_p1 }
   0x5   : > { %p158_p3 = scmp.lt.s32.totalorder (!%p137_p2), %s770_s13, 1  ;;  %v166_v0 = vld [vmem:[%s1027_s1] sm:$0xff] (!%p137_p2)  ;;  %vm191_vm0 = vcmask (!%p137_p2), 130048   ;;  %s895_s22 = smov (!%p137_p2), 120   ;;  %v183_v3 = vld [vmem:[%s1028_s2 + $0x8] sm:$0xff] (!%p137_p2)  ;;  %v896_v4 = vmov (!%p137_p2), 0  }
   0x6   : > { %140 = sbr.rel (%p137_p2) target bundleno = 530 (0x212), region = 32  ;;  %v170_v1 = vld [vmem:[%s1027_s1 + $0x20] sm:$0xff] (!%p137_p2)  ;;  %823 = vmatprep.mubr.msk.f32.mxu0 (!%p137_p2), %vm191_vm0, %v166_v0  ;;  %886 = vset.pattern.permute.xlu1 (!%p137_p2), %v896_v4  ;;  %v184_v6 = vld [vmem:[%s1028_s2 + $0x10] sm:$0xff] (!%p137_p2)  ;;  %v185_v7 = vld [vmem:[%s1028_s2 + $0x18] sm:$0x3f] (!%p137_p2)  ;;  %vm620_vm1 = vcmask (!%p137_p2), 523264  }
   0x7   : > { %833 = vmatprep.mubr.msk.f32.mxu1 (!%p137_p2), %vm191_vm0, %v170_v1  ;;  %885 = vset.pattern.permute.xlu0 (!%p137_p2), %v896_v4  ;;  %v182_v5 = vld [vmem:[%s1028_s2] sm:$0xff] (!%p137_p2)  ;;  %v167_v10 = vld [vmem:[%s1027_s1 + $0x8] sm:$0xff] (!%p137_p2)  ;;  %v168_v12 = vld [vmem:[%s1027_s1 + $0x10] sm:$0xff] (!%p137_p2)  ;;  %vm630_vm2 = vcmask (!%p137_p2), 521216   ;;  %vm673_vm3 = vcmask (!%p137_p2), 130112   ;;  %vm680_vm4 = vcmask (!%p137_p2), 195712  }
   0x8   : > { %599 = vperm.xlu1 (!%p137_p2), %886, %v183_v3   ;;  %v171_v11 = vld [vmem:[%s1027_s1 + $0x28] sm:$0xff] (!%p137_p2)  ;;  %v172_v13 = vld [vmem:[%s1027_s1 + $0x30] sm:$0xff] (!%p137_p2)  ;;  %v169_v14 = vld [vmem:[%s1027_s1 + $0x18] sm:$0x3f] (!%p137_p2)  ;;  %vm687_vm5 = vcmask (!%p137_p2), 261312   ;;  %vm690_vm6 = vcmask (!%p137_p2), 237568  }
   0x9   : > { %v173_v15 = vld [vmem:[%s1027_s1 + $0x38] sm:$0x3f] (!%p137_p2)  ;;  %v174_v16 = vld [vmem:[%s1027_s1 + $0x40] sm:$0xff] (!%p137_p2)  ;;  %v175_v18 = vld [vmem:[%s1027_s1 + $0x48] sm:$0xff] (!%p137_p2) }
   0xa   : > { %v178_v17 = vld [vmem:[%s1027_s1 + $0x60] sm:$0xff] (!%p137_p2)  ;;  %v179_v19 = vld [vmem:[%s1027_s1 + $0x68] sm:$0xff] (!%p137_p2)  ;;  %v176_v20 = vld [vmem:[%s1027_s1 + $0x50] sm:$0xff] (!%p137_p2) }
   0xb   : > { %v180_v21 = vld [vmem:[%s1027_s1 + $0x70] sm:$0xff] (!%p137_p2)  ;;  %v177_v22 = vld [vmem:[%s1027_s1 + $0x58] sm:$0x3f] (!%p137_p2) }
   0xc   : > { %604 = vperm.xlu1 (!%p137_p2), %886, %v184_v6   ;;  %v181_v23 = vld [vmem:[%s1027_s1 + $0x78] sm:$0x3f] (!%p137_p2) }
   0xd   : > { %s1031_s13 = smov (!%p158_p3, %s770_s13), 1 }
   0xe   : > { %s775_s18 = sshll.u32 %s1031_s13, 3  ;;  %s776_s7 = sshll.u32 %s1031_s13, 1 }
   0xf   : > { %s161_s21 = scalar_lea.vmem %s1026_s0, %s775_s18  ;;  %s165_s10 = scalar_lea.vmem %s1029_s3, %s776_s7 }
  0x10   : > { %v186_v2 = vld [vmem:[%s161_s21] sm:$0xff]  ;;  %609 = vperm.xlu1 %886, %v185_v7  }
  0x11   : > { %188 = vrot.lane.b32.xlu0 %v186_v2, %s895_s22 }
  0x15   : > { %594 = vperm.xlu0 %885, %v182_v5  }
  0x83   : > { %v189_v8 = vpop.permute.xlu0 %188 }
  0x84   : > { %v859_v9 = vpack.c.bf16 %v189_v8, %v186_v2 }
  0x86   : > { %860 = vmatprep.subr.bf16.mxu0 %v859_v9  ;;  %864 = vmatprep.subr.bf16.mxu1 %v859_v9 }
  0x87   : > { %862 = vmatpush3.bf16.msra.mxu0 %v859_v9  ;;  %866 = vmatpush3.bf16.msra.mxu1 %v859_v9  ;;  %v600_v24 = vpop.permute.xlu1 %599 }
  0x88   : > { %868 = vmatprep.subr.bf16.mxu0 %v859_v9  ;;  %872 = vmatprep.subr.bf16.mxu1 %v859_v9 }
  0x8a   : > { %824 = vmatmul.mubr.msk.f32.vlgmr.msra.gmra.mrb[0].mxu0 %vm191_vm0, %v167_v10  ;;  %834 = vmatmul.mubr.msk.f32.vlgmr.msra.gmra.mrb[0].mxu1 %vm191_vm0, %v171_v11 }
  0x8b   : > { %870 = vmatpush3.bf16.msra.mxu0 %v859_v9  ;;  %874 = vmatpush3.bf16.msra.mxu1 %v859_v9  ;;  %v605_v37 = vpop.permute.xlu1 %604 }
  0x8c   : > { %826 = vmatprep.mubr.msk.f32.mxu0 %vm191_vm0, %v168_v12  ;;  %836 = vmatprep.mubr.msk.f32.mxu1 %vm191_vm0, %v172_v13  ;;  %v662_v12 = vlaneseq }
  0x8e   : > { %827 = vmatmul.mubr.msk.f32.gmra.mrb[2].mxu0 %vm191_vm0, %v169_v14  ;;  %837 = vmatmul.mubr.msk.f32.gmra.mrb[2].mxu1 %vm191_vm0, %v173_v15  ;;  %v663_v13 = vand.u32 127, %v662_v12  ;;  %v665_v14 = vshrl.u32 %v662_v12, 7 }
  0x8f   : > { %843 = vmatprep.mubr.msk.f32.mxu0 %vm191_vm0, %v174_v16  ;;  %853 = vmatprep.mubr.msk.f32.mxu1 %vm191_vm0, %v178_v17  ;;  %v610_v56 = vpop.permute.xlu1 %609 }
  0x90   : > { %v668_v15 = vadd.s32 4294967288, %v663_v13  ;;  %v675_v16 = vadd.s32 4294967280, %v663_v13 }
  0x92   : > { %844 = vmatmul.mubr.msk.f32.vlgmr.msra.gmra.mrb[4].mxu0 %vm191_vm0, %v175_v18  ;;  %854 = vmatmul.mubr.msk.f32.vlgmr.msra.gmra.mrb[4].mxu1 %vm191_vm0, %v179_v19  ;;  %v671_v19 = vsub.s32 %v668_v15, %v665_v14 }
  0x93   : > { %846 = vmatprep.mubr.msk.f32.mxu0 %vm191_vm0, %v176_v20  ;;  %856 = vmatprep.mubr.msk.f32.mxu1 %vm191_vm0, %v180_v21  ;;  %v666_v20 = vsub.s32 %v663_v13, %v665_v14  ;;  %v682_v21 = vadd.s32 4294967272, %v663_v13 }
  0x94   : > { %v595_v45 = vpop.permute.xlu0 %594 }
  0x96   : > { %847 = vmatmul.mubr.msk.f32.gmra.mrb[6].mxu0 %vm191_vm0, %v177_v22  ;;  %857 = vmatmul.mubr.msk.f32.gmra.mrb[6].mxu1 %vm191_vm0, %v181_v23  ;;  %v678_v22 = vsub.s32 %v675_v16, %v665_v14 }
 0x15d   : > { %v825_v25 = vpop.f32.mrb[0].mxu0  ;;  %v835_v26 = vpop.f32.mrb[0].mxu1 }
 0x15e   : > { %v387_v27 = vmax.f32 %v825_v25, %v835_v26  ;;  %v270_v28 = vpop.f32.mrb[1].mxu0  ;;  %v367_v29 = vpop.f32.mrb[1].mxu1 }
 0x15f   : > { %v386_v30 = vmax.f32 %v270_v28, %v367_v29 }
 0x161   : > { %v828_v31 = vpop.f32.mrb[2].mxu0  ;;  %v838_v32 = vpop.f32.mrb[2].mxu1 }
 0x162   : > { %v389_v33 = vmax.f32 %v828_v31, %v838_v32  ;;  %v280_v34 = vpop.f32.mrb[3].mxu0  ;;  %v377_v35 = vpop.f32.mrb[3].mxu1 }
 0x163   : > { %v388_v36 = vmax.f32 %v280_v34, %v377_v35 }
 0x165   : > { %v845_v38 = vpop.f32.mrb[4].mxu0  ;;  %v855_v39 = vpop.f32.mrb[4].mxu1 }
 0x166   : > { %v488_v40 = vmax.f32 %v387_v27, %v845_v38  ;;  %v468_v41 = vpop.f32.mrb[5].mxu0  ;;  %v569_v42 = vpop.f32.mrb[5].mxu1  ;;  %v685_v27 = vsub.s32 %v682_v21, %v665_v14 }
 0x167   : > { %v487_v43 = vmax.f32 %v386_v30, %v468_v41 }
 0x168   : > { %v589_v44 = vmax.f32 %v488_v40, %v855_v39 }
 0x169   : > { %v588_v46 = vmax.f32 %v487_v43, %v569_v42  ;;  %v848_v47 = vpop.f32.mrb[6].mxu0  ;;  %v858_v48 = vpop.f32.mrb[6].mxu1 }
 0x16a   : > { %v613_v49 = vadd.f32 %v600_v24, %v589_v44  ;;  %v490_v50 = vmax.f32 %v389_v33, %v848_v47  ;;  %v478_v51 = vpop.f32.mrb[7].mxu0  ;;  %v579_v52 = vpop.f32.mrb[7].mxu1 }
 0x16b   : > { %v489_v53 = vmax.f32 %v388_v36, %v478_v51  ;;  %v612_v54 = vadd.f32 %v595_v45, %v588_v46 }
 0x16c   : > { %v591_v55 = vmax.f32 %v490_v50, %v858_v48  ;;  %v617_v57 = vmax.f32 %v613_v49, 0.0 }
 0x16d   : > { %v616_v58 = vmax.f32 %v612_v54, 0.0  ;;  %v590_v59 = vmax.f32 %v489_v53, %v579_v52 }
 0x16e   : > { %v624_v60 = vsel %vm620_vm1, %v617_v57, 0.0  ;;  %v615_v62 = vadd.f32 %v610_v56, %v591_v55  ;;  %v639_v0 = vmul.f32 %v617_v57, %v617_v57 }
 0x16f   : > { %v614_v61 = vadd.f32 %v605_v37, %v590_v59  ;;  %625 = vadd.xlane.f32.xlu1 %v624_v60  ;;  %v621_v63 = vsel %vm620_vm1, %v616_v58, 0.0  ;;  %v638_v5 = vmul.f32 %v616_v58, %v616_v58 }
 0x170   : > { %622 = vadd.xlane.f32.xlu0 %v621_v63  ;;  %v619_v2 = vmax.f32 %v615_v62, 0.0  ;;  %v645_v4 = vsel %vm620_vm1, %v639_v0, 0.0 }
 0x171   : > { %v618_v1 = vmax.f32 %v614_v61, 0.0  ;;  %v642_v7 = vsel %vm620_vm1, %v638_v5, 0.0 }
 0x172   : > { %v631_v6 = vsel %vm630_vm2, %v619_v2, 0.0  ;;  %v641_v10 = vmul.f32 %v619_v2, %v619_v2 }
 0x173   : > { %v627_v3 = vsel %vm620_vm1, %v618_v1, 0.0  ;;  %v640_v8 = vmul.f32 %v618_v1, %v618_v1 }
 0x174   : > { %628 = vadd.xlane.f32.xlu1 %v627_v3  ;;  %646 = vadd.xlane.f32.xlu0 %v645_v4  ;;  %v651_v11 = vsel %vm630_vm2, %v641_v10, 0.0 }
 0x175   : > { %v648_v9 = vsel %vm620_vm1, %v640_v8, 0.0 }
 0x178   : > { %632 = vadd.xlane.f32.xlu1 %v631_v6  ;;  %643 = vadd.xlane.f32.xlu0 %v642_v7 }
 0x17c   : > { %649 = vadd.xlane.f32.xlu0 %v648_v9 }
 0x180   : > { %652 = vadd.xlane.f32.xlu0 %v651_v11 }
 0x1fc   : > { %v626_v17 = vpop.xlane.xlu1 %625 }
 0x1fd   : > { %v623_v18 = vpop.xlane.xlu0 %622  ;;  %v672_v25 = vrot.slane %v626_v17, %v671_v19 }
 0x1fe   : > { %v667_v26 = vrot.slane %v623_v18, %v666_v20 }
 0x200   : > { %v674_v31 = vsel %vm673_vm3, %v672_v25, %v667_v26 }
 0x201   : > { %v629_v23 = vpop.xlane.xlu1 %628  ;;  %v647_v24 = vpop.xlane.xlu0 %646 }
 0x202   : > { %v679_v28 = vrot.slane %v629_v23, %v678_v22  ;;  %v703_v38 = vrot.slane %v647_v24, %v671_v19 }
 0x204   : > { %v681_v33 = vsel %vm680_vm4, %v679_v28, %v674_v31 }
 0x205   : > { %v633_v29 = vpop.xlane.xlu1 %632  ;;  %v644_v30 = vpop.xlane.xlu0 %643 }
 0x206   : > { %v686_v32 = vrot.slane %v633_v29, %v685_v27  ;;  %v699_v36 = vrot.slane %v644_v30, %v666_v20 }
 0x208   : > { %v688_v34 = vsel %vm687_vm5, %v686_v32, %v681_v33  ;;  %v704_v40 = vsel %vm673_vm3, %v703_v38, %v699_v36 }
 0x209   : > { %691 = vst.msk [vmem:[%s165_s10] sm:$0x1] %vm690_vm6, %v688_v34  ;;  %v650_v35 = vpop.xlane.xlu0 %649 }
 0x20a   : > { %v708_v37 = vrot.slane %v650_v35, %v678_v22 }
 0x20c   : > { %v709_v42 = vsel %vm680_vm4, %v708_v37, %v704_v40 }
 0x20d   : > { %v653_v39 = vpop.xlane.xlu0 %652 }
 0x20e   : > { %v713_v41 = vrot.slane %v653_v39, %v685_v27 }
 0x210   : > { %v714_v43 = vsel %vm687_vm5, %v713_v41, %v709_v42 }
 0x211   : > { %716 = vst.msk [vmem:[%s165_s10 + $0x1] sm:$0x1] %vm690_vm6, %v714_v43 }
 0x212 PF: > { %s13_s12 = sadd.s32 1, %s893_s12  }
 0x213   : > { %p10_p4 = scmp.ge.s32.totalorder %s13_s12, 4  }
 0x215   :  { %12 = sbr.rel (!%p10_p4) target bundleno = 1 (0x1), region = 62 }

</bundles_post_ra>
